<compile_context>
chip_gen: v7x
topology: tpu7x:2x2x1
jax: 0.10.0
libtpu: 0.0.40
codegen_flags: <defaults>
</compile_context>

<pallas_src>
import functools
import math

import jax
import jax.numpy as jnp
import numpy as np
from jax.experimental import pallas as pl
from jax.experimental.pallas import tpu as pltpu


# ----------------------------------------------------------------------------
# Pallas kernel: one (batch, seq-tile) block of the cos/sin tables
# ----------------------------------------------------------------------------
def _rope_kernel(pos_ref, inv_ref, cos_ref, sin_ref, *,
                 attention_scaling, n_pos_dims, rotary_half):
    # pos_ref : (1, TILE_S, P)  int32
    # inv_ref : (P, H)          float32
    # cos_ref/sin_ref : (1, TILE_S, 2*H) float32
    H = rotary_half
    pos = pos_ref[0].astype(jnp.float32)            # (TILE_S, P)
    inv = inv_ref[...]                              # (P, H)

    # freqs[s, h] = sum_p pos[s, p] * inv[p, h]   (P is 1 or 2 -> unrolled)
    freqs = pos[:, 0:1] * inv[0:1, :]               # (TILE_S, H)
    for p in range(1, n_pos_dims):
        freqs = freqs + pos[:, p:p + 1] * inv[p:p + 1, :]

    c = jnp.cos(freqs)                              # transcendentals on H lanes only
    s = jnp.sin(freqs)
    if attention_scaling != 1.0:
        c = c * attention_scaling
        s = s * attention_scaling

    # duplicate-concat: write the H-wide result into both halves of head_dim
    cos_ref[0, :, 0:H] = c
    cos_ref[0, :, H:2 * H] = c
    sin_ref[0, :, 0:H] = s
    sin_ref[0, :, H:2 * H] = s


def rope_cos_sin_pallas(pos_bsp, inv_ph, attention_scaling, *, tile_s=None):
    """pos_bsp: (B, S, P) int32; inv_ph: (P, H) f32 -> cos, sin : (B, S, 2H) f32."""
    pos_bsp = jnp.asarray(pos_bsp, jnp.int32)
    inv_ph = jnp.asarray(inv_ph, jnp.float32)
    B, S, P = pos_bsp.shape
    P2, H = inv_ph.shape
    assert P == P2
    D = 2 * H

    # Tile the sequence axis. ~512 rows keeps per-output tiles small enough for
    # v7x's 64 MiB VMEM (even at head_dim=128, double-buffered) while staying
    # near the HBM roofline; small S just uses the full extent.
    if tile_s is None:
        tile_s = 512
    if tile_s >= S:
        tile_s = S
    else:
        tile_s = max(8, (tile_s // 8) * 8)   # keep (8,128)-friendly sublane count

    grid = (B, pl.cdiv(S, tile_s))
    kernel = functools.partial(
        _rope_kernel,
        attention_scaling=float(attention_scaling),
        n_pos_dims=P,
        rotary_half=H,
    )
    out_sd = jax.ShapeDtypeStruct((B, S, D), jnp.float32)
    cost = pl.CostEstimate(
        flops=2 * B * S * H * P,
        transcendentals=2 * B * S * H,
        bytes_accessed=2 * B * S * D * 4 + B * S * P * 4 + P * H * 4,
    )

    cos, sin = pl.pallas_call(
        kernel,
        out_shape=(out_sd, out_sd),
        grid_spec=pltpu.PrefetchScalarGridSpec(
            num_scalar_prefetch=0,
            grid=grid,
            in_specs=[
                # position ids: one (batch, seq-tile) slab, P on the lane axis
                pl.BlockSpec((1, tile_s, P), lambda b, si: (b, si, 0)),
                # inv_freq: tiny, resident (constant block index -> no re-DMA)
                pl.BlockSpec((P2, H), lambda b, si: (0, 0)),
            ],
            out_specs=(
                pl.BlockSpec((1, tile_s, D), lambda b, si: (b, si, 0)),
                pl.BlockSpec((1, tile_s, D), lambda b, si: (b, si, 0)),
            ),
        ),
        compiler_params=pltpu.CompilerParams(
            dimension_semantics=("parallel", "parallel"),
        ),
        cost_estimate=cost,
    )(pos_bsp, inv_ph)
    return cos, sin


# ----------------------------------------------------------------------------
# Parameter-setup glue (mirrors the PyTorch __init__ / ROPE init functions)
# ----------------------------------------------------------------------------
def default_rope_init(head_dim, rope_theta):
    """transformers 'default' rope init: inv_freq (head_dim//2,), attention_scaling=1.0."""
    inv_freq = 1.0 / (
        rope_theta ** (np.arange(0, head_dim, 2, dtype=np.float64) / head_dim)
    )
    return inv_freq.astype(np.float32), 1.0


def inv_freq_for_multidimensional_rope(inv_freq, d_positions, division_ratios=None):
    """Numpy port of get_inv_freq_for_multidimensional_rope."""
    half = inv_freq.shape[0]
    if division_ratios is None:
        division_ratios = [(i + 1) / d_positions for i in range(d_positions)]
    div = [0] + [round(r * half) for r in division_ratios]
    partitioned = [inv_freq[a:b] for a, b in zip(div[:-1], div[1:])]
    rows = []
    for _ in range(d_positions):
        rows.append(np.concatenate(partitioned))
        partitioned = partitioned[-1:] + partitioned[:-1]
    return np.stack(rows)  # (d_positions, half)


class RotaryEmbeddingPallas:
    """Pallas re-implementation of RotaryEmbedding (rope_type='default' or 'default_multirope')."""

    def __init__(self, head_dim=32, rope_theta=10000.0, d_positions=None,
                 multipos_type=None, n_positions=2048, tile_s=None):
        self.d_positions = d_positions
        self.max_seq_len_cached = n_positions
        self.tile_s = tile_s
        inv_freq, self.attention_scaling = default_rope_init(head_dim, rope_theta)
        if d_positions is not None and multipos_type is not None:
            if multipos_type == "multirope":
                inv_freq = inv_freq_for_multidimensional_rope(inv_freq, d_positions)
            else:
                # TODO(synk): 'hirope' builds a block-diagonal inv_freq whose forward
                # contraction differs in shape; only 'multirope' is wired up here.
                raise NotImplementedError("hirope not wired to the Pallas kernel")
        self.inv_freq = np.asarray(inv_freq, dtype=np.float32)
        # TODO(synk): 'dynamic' rope_type recomputation (_dynamic_frequency_update) is
        # host-side buffer management, not part of the kernel hot path.

    def __call__(self, position_ids):
        # int32 -> float32 is exact up to 2**24 positions (matches f32 reference).
        position_ids = jnp.asarray(position_ids, dtype=jnp.int32)
        if self.d_positions is None:
            # position_ids: (B, S) -> (B, S, P=1)
            pos_bsp = position_ids[:, :, None]
            inv = jnp.asarray(self.inv_freq)[None, :]            # (1, H)
        else:
            # position_ids: (P, B, S) -> (B, S, P)
            pos_bsp = jnp.transpose(position_ids, (1, 2, 0))
            inv = jnp.asarray(self.inv_freq)                     # (P, H)
        return rope_cos_sin_pallas(pos_bsp, inv, self.attention_scaling,
                                   tile_s=self.tile_s)


# ----------------------------------------------------------------------------
# Pure-JAX reference (mirrors the PyTorch forward) for verification
# ----------------------------------------------------------------------------
def _reference(position_ids, inv_freq, attention_scaling, d_positions):
    position_ids = jnp.asarray(position_ids, jnp.float32)
    inv_freq = jnp.asarray(inv_freq, jnp.float32)
    if d_positions is None:
        B = position_ids.shape[-2]
        inv_e = jnp.broadcast_to(inv_freq[None, :, None], (B, inv_freq.shape[0], 1))
        pos_e = position_ids[:, None, :]
        freqs = jnp.swapaxes(inv_e @ pos_e, -2, -1)            # (B, S, H)
    else:
        B = position_ids.shape[-2]
        inv_e = jnp.broadcast_to(inv_freq[:, None, :, None],
                                 (inv_freq.shape[0], B, inv_freq.shape[1], 1))
        pos_e = position_ids[:, :, None, :]
        freqs = jnp.swapaxes(inv_e @ pos_e, -2, -1).sum(0)     # (B, S, H)
    emb = jnp.concatenate([freqs, freqs], axis=-1)
    return jnp.cos(emb) * attention_scaling, jnp.sin(emb) * attention_scaling


if __name__ == "__main__":
    key = jax.random.PRNGKey(0)
    B, S, head_dim = 2, 8, 32

    # ---- default rope (d_positions=None) ----
    rope = RotaryEmbeddingPallas(head_dim=head_dim, rope_theta=10000.0)
    position_ids = jax.random.randint(key, (B, S), minval=0, maxval=128, dtype=jnp.int32)
    cos, sin = rope(position_ids)
    jax.block_until_ready((cos, sin))
    cos_ref, sin_ref = _reference(position_ids, rope.inv_freq, rope.attention_scaling, None)
    assert cos.shape == (B, S, head_dim) and sin.shape == (B, S, head_dim)
    np.testing.assert_allclose(np.asarray(cos), np.asarray(cos_ref), rtol=1e-5, atol=1e-5)
    np.testing.assert_allclose(np.asarray(sin), np.asarray(sin_ref), rtol=1e-5, atol=1e-5)

    # ---- multirope (d_positions=2) ----
    d_pos = 2
    rope_m = RotaryEmbeddingPallas(head_dim=head_dim, rope_theta=10000.0,
                                   d_positions=d_pos, multipos_type="multirope")
    key2 = jax.random.PRNGKey(1)
    position_ids_m = jax.random.randint(key2, (d_pos, B, S), minval=0, maxval=128,
                                        dtype=jnp.int32)
    cos_m, sin_m = rope_m(position_ids_m)
    jax.block_until_ready((cos_m, sin_m))
    cos_mr, sin_mr = _reference(position_ids_m, rope_m.inv_freq,
                                rope_m.attention_scaling, d_pos)
    np.testing.assert_allclose(np.asarray(cos_m), np.asarray(cos_mr), rtol=1e-5, atol=1e-5)
    np.testing.assert_allclose(np.asarray(sin_m), np.asarray(sin_mr), rtol=1e-5, atol=1e-5)

    # ---- exercise the tiled/gridded path (grid = (B, S//tile_s) = (2, 2)) ----
    S2 = 16
    rope_t = RotaryEmbeddingPallas(head_dim=head_dim, rope_theta=10000.0, tile_s=8)
    key3 = jax.random.PRNGKey(2)
    position_ids_t = jax.random.randint(key3, (B, S2), minval=0, maxval=2048,
                                        dtype=jnp.int32)
    cos_t, sin_t = rope_t(position_ids_t)
    jax.block_until_ready((cos_t, sin_t))
    cos_tr, sin_tr = _reference(position_ids_t, rope_t.inv_freq,
                                rope_t.attention_scaling, None)
    np.testing.assert_allclose(np.asarray(cos_t), np.asarray(cos_tr), rtol=1e-5, atol=1e-5)
    np.testing.assert_allclose(np.asarray(sin_t), np.asarray(sin_tr), rtol=1e-5, atol=1e-5)

    print("KERNEL_OK")
</pallas_src>

<mosaic_0001>
module attributes {stable_mosaic.version = 11 : i64} {
  func.func @_rope_kernel(%arg0: i32, %arg1: i32, %arg2: memref<1x8x1xi32, #tpu.memory_space<vmem>>, %arg3: memref<1x16xf32, #tpu.memory_space<vmem>>, %arg4: memref<1x8x32xf32, #tpu.memory_space<vmem>>, %arg5: memref<1x8x32xf32, #tpu.memory_space<vmem>>) attributes {dimension_semantics = [#tpu.dimension_semantics<parallel>, #tpu.dimension_semantics<parallel>], iteration_bounds = array<i64: 2, 1>, scalar_prefetch = 0 : i64, scratch_operands = 0 : i64, tpu.core_type = #tpu.core_type<tc>, window_params = [{transform_indices = @transform_0, window_bounds = array<i64: 1, 8, 1>}, {pipeline_mode = #tpu.pipeline_mode<synchronous>, transform_indices = @transform_1, window_bounds = array<i64: 1, 16>}, {transform_indices = @transform_2, window_bounds = array<i64: 1, 8, 32>}, {transform_indices = @transform_3, window_bounds = array<i64: 1, 8, 32>}]} {
    %c0 = arith.constant 0 : index
    %c0_0 = arith.constant 0 : index
    %c0_1 = arith.constant 0 : index
    %0 = vector.load %arg2[%c0, %c0_0, %c0_1] : memref<1x8x1xi32, #tpu.memory_space<vmem>>, vector<1x8x1xi32>
    %1 = vector.shape_cast %0 : vector<1x8x1xi32> to vector<8x1xi32>
    %2 = arith.sitofp %1 : vector<8x1xi32> to vector<8x1xf32>
    %c0_2 = arith.constant 0 : index
    %c0_3 = arith.constant 0 : index
    %3 = vector.load %arg3[%c0_2, %c0_3] : memref<1x16xf32, #tpu.memory_space<vmem>>, vector<1x16xf32>
    %4 = vector.broadcast %2 : vector<8x1xf32> to vector<8x16xf32>
    %5 = vector.broadcast %3 : vector<1x16xf32> to vector<8x16xf32>
    %6 = arith.mulf %4, %5 : vector<8x16xf32>
    %7 = math.cos %6 : vector<8x16xf32>
    %8 = math.sin %6 : vector<8x16xf32>
    %c0_4 = arith.constant 0 : index
    %c0_5 = arith.constant 0 : index
    %c0_6 = arith.constant 0 : index
    %9 = vector.load %arg4[%c0_4, %c0_5, %c0_6] : memref<1x8x32xf32, #tpu.memory_space<vmem>>, vector<1x8x16xf32>
    %10 = vector.shape_cast %9 : vector<1x8x16xf32> to vector<8x16xf32>
    %11 = vector.shape_cast %7 : vector<8x16xf32> to vector<1x8x16xf32>
    tpu.vector_store %arg4[%c0_4, %c0_5, %c0_6], %11 {strides = array<i32>} : memref<1x8x32xf32, #tpu.memory_space<vmem>>, vector<1x8x16xf32>,
    %c0_7 = arith.constant 0 : index
    %c0_8 = arith.constant 0 : index
    %c16 = arith.constant 16 : index
    %12 = vector.load %arg4[%c0_7, %c0_8, %c16] : memref<1x8x32xf32, #tpu.memory_space<vmem>>, vector<1x8x16xf32>
    %13 = vector.shape_cast %12 : vector<1x8x16xf32> to vector<8x16xf32>
    %14 = vector.shape_cast %7 : vector<8x16xf32> to vector<1x8x16xf32>
    tpu.vector_store %arg4[%c0_7, %c0_8, %c16], %14 {strides = array<i32>} : memref<1x8x32xf32, #tpu.memory_space<vmem>>, vector<1x8x16xf32>,
    %c0_9 = arith.constant 0 : index
    %c0_10 = arith.constant 0 : index
    %c0_11 = arith.constant 0 : index
    %15 = vector.load %arg5[%c0_9, %c0_10, %c0_11] : memref<1x8x32xf32, #tpu.memory_space<vmem>>, vector<1x8x16xf32>
    %16 = vector.shape_cast %15 : vector<1x8x16xf32> to vector<8x16xf32>
    %17 = vector.shape_cast %8 : vector<8x16xf32> to vector<1x8x16xf32>
    tpu.vector_store %arg5[%c0_9, %c0_10, %c0_11], %17 {strides = array<i32>} : memref<1x8x32xf32, #tpu.memory_space<vmem>>, vector<1x8x16xf32>,
    %c0_12 = arith.constant 0 : index
    %c0_13 = arith.constant 0 : index
    %c16_14 = arith.constant 16 : index
    %18 = vector.load %arg5[%c0_12, %c0_13, %c16_14] : memref<1x8x32xf32, #tpu.memory_space<vmem>>, vector<1x8x16xf32>
    %19 = vector.shape_cast %18 : vector<1x8x16xf32> to vector<8x16xf32>
    %20 = vector.shape_cast %8 : vector<8x16xf32> to vector<1x8x16xf32>
    tpu.vector_store %arg5[%c0_12, %c0_13, %c16_14], %20 {strides = array<i32>} : memref<1x8x32xf32, #tpu.memory_space<vmem>>, vector<1x8x16xf32>,
    return
  }
  func.func @transform_0(%arg0: i32, %arg1: i32) -> (i32, i32, i32) {
    %c0_i32 = arith.constant 0 : i32
    %c0_i32_0 = arith.constant 0 : i32
    return %arg0, %arg1, %c0_i32 : i32, i32, i32
  }
  func.func @transform_1(%arg0: i32, %arg1: i32) -> (i32, i32) {
    %c0_i32 = arith.constant 0 : i32
    %c0_i32_0 = arith.constant 0 : i32
    %c0_i32_1 = arith.constant 0 : i32
    return %c0_i32, %c0_i32_0 : i32, i32
  }
  func.func @transform_2(%arg0: i32, %arg1: i32) -> (i32, i32, i32) {
    %c0_i32 = arith.constant 0 : i32
    %c0_i32_0 = arith.constant 0 : i32
    return %arg0, %arg1, %c0_i32 : i32, i32, i32
  }
  func.func @transform_3(%arg0: i32, %arg1: i32) -> (i32, i32, i32) {
    %c0_i32 = arith.constant 0 : i32
    %c0_i32_0 = arith.constant 0 : i32
    return %arg0, %arg1, %c0_i32 : i32, i32, i32
  }
}

</mosaic_0001>

<bundles_post_ra>
// kernel: tpu_custom_call.1
= control target key start
LH: loop header
LB: loop body
LE: loop exit
PB: predicated region body
PF: predicated region fallthrough
CT: control target
= control target key end

     0   :  { %9 = vsyncpa [#allocation3], 0  ;;  %s991_s0 = inlined_call_operand.vmem [shape: s32[2,8,1], index: 0, kind: input, shape index: {}]   ;;  %s992_s1 = inlined_call_operand.vmem [shape: f32[1,16], index: 1, kind: input, shape index: {}]   ;;  %s993_s2 = inlined_call_operand.hbm [shape: f32[2,8,32], index: 2, kind: output, shape index: {0}]   ;;  %s994_s3 = inlined_call_operand.hbm [shape: f32[2,8,32], index: 3, kind: output, shape index: {1}]  }
   0x1   :  { %11 = vsyncpa [#allocation3 + $0x1], 0 }
   0x2   :  { %12 = vsyncpa [#allocation5], 0 }
   0x3   :  { %14 = vsyncpa [#allocation5 + $0x1], 0  ;;  %s820_s12 = smov 0   ;;  %s822_s13 = smov 0  }
   0x4   :  { %s824_s14 = smov 0   ;;  %s826_s15 = smov 0  }
   0x5   :  { %s828_s16 = smov 0   ;;  %s830_s17 = smov 0  }
   0x6 LB: > { %s578_s18 = sadd.s32 4294967295, %s788_s17   ;;  %s579_s19 = sadd.s32 4294967294, %s788_s17   ;;  %s788_s17 = sphi %s830_s17, %s20_s17   ;;  %s784_s16 = sphi %s828_s16, %s1001_s16   ;;  %s780_s15 = sphi %s826_s15, %s1000_s15   ;;  %s776_s14 = sphi %s824_s14, %s999_s14   ;;  %s772_s13 = sphi %s822_s13, %s998_s13   ;;  %s768_s12 = sphi %s820_s12, %s997_s12  }
   0x7   : > { %s32_s20 = sadd.s32 1, %s784_s16  ;;  %s90_s21 = sadd.s32 1, %s776_s14 }
   0x8   : > { %p34_p0 = scmp.ge.s32.totalorder %s32_s20, 2  ;;  %p100_p1 = scmp.ne.s32.totalorder %s776_s14, %s772_s13 }
   0x9   : > { %p101_p2 = scmp.eq.s32.totalorder %s578_s18, 1  ;;  %p106_p3 = scmp.ne.s32.totalorder %s772_s13, %s768_s12 }
   0xa   : > { %s1003_s20 = smov (%p34_p0, %s32_s20), 0  ;;  %p107_p5 = scmp.eq.s32.totalorder %s579_s19, 1 }
   0xb   : > { %p860_p4 = por %p101_p2, %p100_p1  ;;  %s85_s23 = ssub.s32 %s784_s16, %s1003_s20 }
   0xc   : > { %p582_p6 = scmp.ge.s32.totalorder %s788_s17, 1  ;;  %p88_p7 = scmp.eq.s32.totalorder %s85_s23, 0 }
   0xd   : > { %p867_p8 = por %p107_p5, %p106_p3  ;;  %p166_p9 = scmp.lt.s32.totalorder %s788_s17, 3 }
   0xe   : > { %s873_s25 = scalar_select %p88_p7, %s776_s14, %s90_s21  }
   0xf   : > { %p167_p10 = pnand %p582_p6, %p166_p9 }
  0x10   : > { %p197_p11 = scmp.lt.s32.totalorder (!%p167_p10), %s780_s15, 1  ;;  %v790_v0 = vmov (!%p167_p10), 0   ;;  %v586_v3 = vld [vmem:[%s992_s1] ss:$0 sm:$0xff] (!%p167_p10)  ;;  %v791_v17 = vmov (!%p167_p10), 2102212464  }
  0x11   : > { %170 = sbr.rel (%p167_p10) target bundleno = 392 (0x188), region = 28  ;;  %673 = vset.pattern.permute.xlu0 (!%p167_p10), %v790_v0  ;;  %v792_v19 = vmov (!%p167_p10), 920167782   ;;  %v793_v23 = vmov (!%p167_p10), 1326507024   ;;  %s904_s6 = sand.u32 (!%p167_p10), 1, %s772_s13  }
  0x12   : > { %v794_v25 = vmov (!%p167_p10), 683565275   ;;  %v795_v27 = vmov (!%p167_p10), 2475754826   ;;  %v796_v30 = vmov (!%p167_p10), 2131351028  }
  0x13   : > { %s583_s7 = sshll.u32 (!%p167_p10), %s904_s6, 3  ;;  %vm426_vm10 = vcmask (!%p167_p10), 130048   ;;  %s797_s8 = smov (!%p167_p10), 16  }
  0x14   : > { %s196_s9 = scalar_lea.vmem (!%p167_p10), [#allocation4], %s583_s7  ;;  %s189_s10 = scalar_lea.vmem (!%p167_p10), [#allocation2], %s583_s7 }
  0x15   : > { %s597_s11 = sshll.u32 (!%p167_p10), %s780_s15, 7  ;;  %s460_s18 = sshll.u32 (!%p167_p10), %s189_s10, 4  ;;  %s916_s18 = int_to_ptr.vmem [resolvable:$true] %s460_s18 }
  0x16   : > { %s474_s19 = sshll.u32 (!%p167_p10), %s196_s9, 4  ;;  %s921_s29 = scalar_lea.hbm (!%p167_p10), %s994_s3, %s597_s11  ;;  %s923_s19 = int_to_ptr.vmem [resolvable:$true] %s474_s19 }
  0x17   : > { %s798_s4 = smov (!%p167_p10), [#allocation2]  }
  0x18   : > { %s198_s26 = scalar_select %p197_p11, %s780_s15, 1 }
  0x19   : > { %s441_s15 = scalar_lea.sflag [#allocation3], %s904_s6  ;;  %s682_s5 = sshll.u32 %s798_s4, 4  ;;  %s683_s5 = int_to_ptr.vmem [resolvable:$false] %s682_s5 }
  0x1a   : > { %s585_s27 = sshll.u32 %s198_s26, 3  ;;  %s914_s26 = scalar_lea.hbm %s993_s2, %s597_s11 }
  0x1b   : > { %s203_s30 = scalar_lea.vmem %s991_s0, %s585_s27  ;;  %s684_s7 = scalar_lea.vmem %s683_s5, 256 }
  0x1c   : > { %v204_v1 = vld [vmem:[%s203_s30] sm:$0xff]  ;;  %s678_s30 = scalar_lea.vmem %s916_s18, 128  ;;  %p685_p1 = scmp.lt.s32.totalorder %s916_s18, %s683_s5 }
  0x1d   : > { %v205_v2 = vcvt.s32.f32 %v204_v1  ;;  %p679_p12 = scmp.ne.s32.totalorder %s916_s18, %s678_s30  ;;  %p686_p2 = scmp.lt.s32.totalorder %s684_s7, %s678_s30 }
  0x1f   : > { %209 = vperm.xlu0 %673, %v205_v2   ;;  %p680_p13 = pnand %p679_p12, %p860_p4  ;;  %p687_p3 = por %p686_p2, %p685_p1 }
  0x21   : > { %p681_p0 = pneg %p680_p13 }
  0x23   : > { %p688_p5 = pnand %p687_p3, %p681_p0 }
  0x9e   : > { %v210_v4 = vpop.permute.xlu0 %209 }
  0x9f   : > { %v883_v5 = vmul.f32 %v586_v3, %v210_v4 }
  0xa1   : > { %v222_v6 = vand.u32 2139095040, %v883_v5  ;;  %v219_v7 = vand.u32 2147483647, %v883_v5  ;;  %vm221_vm7 = vcmp.lt.s32.totalorder %v883_v5, 0 }
  0xa3   : > { %v223_v8 = vshrl.u32 %v222_v6, 23  ;;  %v226_v10 = vand.u32 8388607, %v219_v7  ;;  %vm220_vm8 = vcmp.le.f32.partialorder %v219_v7, 0.7853982 }
  0xa5   : > { %v587_v9 = vadd.s32 4294967169, %v223_v8  ;;  %v227_v13 = vor.u32 8388608, %v226_v10 }
  0xa7   : > { %v229_v11 = vadd.s32 1, %v587_v9  ;;  %v267_v21 = vshll.u32 %v227_v13, 8 }
  0xa9   : > { %vm230_vm0 = vcmp.gt.s32.totalorder %v229_v11, 0 }
  0xaa   : > { %v231_v12 = vsel %vm230_vm0, %v229_v11, 0  ;;  %vm311_vm0 = vweird.f32 %v883_v5 }
  0xab   : > { %v233_v14 = vand.u32 31, %v231_v12  ;;  %v232_v15 = vshrl.u32 %v231_v12, 5 }
  0xad   : > { %v234_v16 = vsub.s32 32, %v233_v14  ;;  %v245_v18 = vshll.u32 %v791_v17, %v233_v14  ;;  %v248_v20 = vshll.u32 %v792_v19, %v233_v14  ;;  %v236_v26 = vshll.u32 %v794_v25, %v233_v14 }
  0xae   : > { %v239_v29 = vshll.u32 %v795_v27, %v233_v14  ;;  %v242_v32 = vshll.u32 %v796_v30, %v233_v14  ;;  %vm254_vm1 = vcmp.lt.s32.totalorder %v232_v15, 4  ;;  %vm251_vm2 = vcmp.lt.s32.totalorder %v232_v15, 1 }
  0xaf   : > { %v246_v22 = vshrl.u32 %v792_v19, %v234_v16  ;;  %v249_v24 = vshrl.u32 %v793_v23, %v234_v16  ;;  %v237_v28 = vshrl.u32 %v795_v27, %v234_v16  ;;  %v240_v31 = vshrl.u32 %v796_v30, %v234_v16 }
  0xb0   : > { %v243_v33 = vshrl.u32 %v791_v17, %v234_v16  ;;  %v235_v37 = vshrl.u32 %v794_v25, %v234_v16  ;;  %vm252_vm3 = vcmp.lt.s32.totalorder %v232_v15, 2  ;;  %vm253_vm4 = vcmp.lt.s32.totalorder %v232_v15, 3 }
  0xb1   : > { %v247_v34 = vor.u32 %v246_v22, %v245_v18  ;;  %v250_v35 = vor.u32 %v249_v24, %v248_v20  ;;  %v238_v36 = vor.u32 %v237_v28, %v236_v26  ;;  %v241_v38 = vor.u32 %v240_v31, %v239_v29 }
  0xb2   : > { %v244_v39 = vor.u32 %v243_v33, %v242_v32 }
  0xb3   : > { %v260_v40 = vsel %vm254_vm1, %v247_v34, 920167782  ;;  %v264_v41 = vsel %vm254_vm1, %v250_v35, 1326507024  ;;  %v259_v43 = vsel %vm251_vm2, %v238_v36, %v241_v38  ;;  %v255_v46 = vsel %vm251_vm2, %v235_v37, %v238_v36 }
  0xb4   : > { %v256_v42 = vsel %vm254_vm1, %v244_v39, 2102212464  ;;  %v261_v44 = vsel %vm253_vm4, %v244_v39, %v260_v40  ;;  %v263_v45 = vsel %vm251_vm2, %v241_v38, %v244_v39  ;;  %v265_v49 = vsel %vm253_vm4, %v247_v34, %v264_v41 }
  0xb5   : > { %v257_v47 = vsel %vm253_vm4, %v241_v38, %v256_v42  ;;  %v262_v48 = vsel %vm252_vm3, %v259_v43, %v261_v44  ;;  %v266_v50 = vsel %vm252_vm3, %v263_v45, %v265_v49  ;;  %vm432_vm1 = vcmask 261248  }
  0xb6   : > { %v889_v51 = vmul.u32.u64.low %v267_v21, %v262_v48  ;;  %v890_v52 = vmul.u32.u64.high %v267_v21, %v262_v48, %v889_v51  ;;  %v892_v53 = vmul.u32.u64.low %v267_v21, %v266_v50  ;;  %v893_v54 = vmul.u32.u64.high %v267_v21, %v266_v50, %v892_v53 }
  0xb7   : > { %v258_v55 = vsel %vm252_vm3, %v255_v46, %v257_v47 }
  0xb8   : > { %v277_v56 = vadd.s32 1, %v890_v52  ;;  %v274_v57 = vmul.u32 %v267_v21, %v258_v55  ;;  %vm276_vm5 = vc.u32 %v893_v54, %v889_v51  ;;  %v275_v6 = vadd.s32 %v889_v51, %v893_v54 }
  0xba   : > { %v278_v58 = vsel %vm276_vm5, %v277_v56, %v890_v52 }
  0xbb   : > { %v279_v59 = vadd.s32 %v278_v58, %v274_v57 }
  0xbd   : > { %v280_v60 = vadd.s32 536870912, %v279_v59 }
  0xbf   : > { %v281_v61 = vshrl.u32 %v280_v60, 30 }
  0xc1   : > { %v282_v62 = vshll.u32 %v281_v61, 30  ;;  %v305_v19 = vsub.s32 4, %v281_v61 }
  0xc3   : > { %v283_v63 = vsub.s32 %v279_v59, %v282_v62  ;;  %v306_v22 = vsel %vm221_vm7, %v305_v19, %v281_v61 }
  0xc4   : > { %v308_v24 = vsel %vm220_vm8, 0, %v306_v22 }
  0xc5   : > { %v285_v0 = vsub.s32 0, %v283_v63  ;;  %v415_v25 = vadd.s32 3, %v308_v24  ;;  %v312_v27 = vand.u32 3, %v308_v24 }
  0xc7   : > { %v588_v1 = vmin.u32 %v285_v0, %v283_v63  ;;  %v416_v26 = vand.u32 3, %v415_v25  ;;  %vm317_vm11 = vcmp.eq.s32.totalorder %v312_v27, 2  ;;  %vm314_vm13 = vcmp.eq.s32.totalorder %v312_v27, 0 }
  0xc8   : > { %vm313_vm15 = vcmp.lt.s32.totalorder %v312_v27, 2 }
  0xc9   : > { %v287_v2 = vclz %v588_v1  ;;  %vm421_vm9 = vcmp.eq.s32.totalorder %v416_v26, 2  ;;  %vm418_vm12 = vcmp.eq.s32.totalorder %v416_v26, 0  ;;  %vm417_vm14 = vcmp.lt.s32.totalorder %v416_v26, 2 }
  0xcb   : > { %v589_v3 = vadd.s32 4294967294, %v287_v2 }
  0xcd   : > { %vm590_vm6 = vcmp.lt.s32.totalorder %v589_v3, 0 }
  0xce   : > { %v290_v4 = vsel %vm590_vm6, 0, %v589_v3 }
  0xcf   : > { %v291_v8 = vsub.s32 32, %v290_v4  ;;  %v295_v9 = vsub.s32 4294967266, %v290_v4  ;;  %v292_v10 = vshll.u32 %v283_v63, %v290_v4 }
  0xd1   : > { %v293_v11 = vshrl.u32 %v275_v6, %v291_v8  ;;  %v296_v12 = vadd.s32 127, %v295_v9 }
  0xd3   : > { %v294_v13 = vor.u32 %v293_v11, %v292_v10  ;;  %v297_v14 = vshll.u32 %v296_v12, 23 }
  0xd5   : > { %v298_v15 = vor.u32 4788187, %v297_v14  ;;  %v301_v17 = vcvt.s32.f32 %v294_v13 }
  0xd7   : > { %v299_v16 = vand.u32 2147483647, %v298_v15 }
  0xd9   : > { %v302_v18 = vmul.f32 %v301_v17, %v299_v16 }
  0xdb   : > { %v303_v20 = vxor.u32 2147483648, %v302_v18 }
  0xdd   : > { %v304_v21 = vsel %vm221_vm7, %v303_v20, %v302_v18 }
  0xde   : > { %v307_v23 = vsel %vm220_vm8, %v883_v5, %v304_v21 }
  0xdf   : > { %674 = vcosq.f32 %v307_v23 }
  0xe0   : > { %676 = vsinq.f32 %v307_v23 }
  0xe9   : > { %v675_v28 = vpop.eup %674 }
  0xea   : > { %v677_v29 = vpop.eup %676  ;;  %v318_v30 = vxor.u32 2147483648, %v675_v28 }
  0xeb   : > { %v315_v31 = vxor.u32 2147483648, %v677_v29 }
  0xec   : > { %v423_v7 = vsel %vm421_vm9, %v318_v30, %v677_v29  ;;  %v319_v32 = vsel %vm317_vm11, %v318_v30, %v677_v29 }
  0xed   : > { %v420_v33 = vsel %vm418_vm12, %v675_v28, %v315_v31  ;;  %v316_v34 = vsel %vm314_vm13, %v675_v28, %v315_v31 }
  0xee   : > { %v424_v35 = vsel %vm417_vm14, %v420_v33, %v423_v7  ;;  %v320_v36 = vsel %vm313_vm15, %v316_v34, %v319_v32 }
  0xef   : > { %v425_v37 = vsel %vm311_vm0, nan, %v424_v35  ;;  %v321_v38 = vsel %vm311_vm0, nan, %v320_v36 }
  0xf0   : > { %436 = vrot.lane.b32.xlu1 %v425_v37, %s797_s8  ;;  %434 = vst.msk [vmem:[%s196_s9] sm:$0xff] %vm426_vm10, %v425_v37  ;;  %429 = vrot.lane.b32.xlu0 %v321_v38, %s797_s8  ;;  %427 = vst.msk [vmem:[%s189_s10] sm:$0xff] %vm426_vm10, %v321_v38 }
 0x162   : > { %v437_v5 = vpop.permute.xlu1 %436  ;;  %v430_v39 = vpop.permute.xlu0 %429 }
 0x163   : > { %433 = vst.msk [vmem:[%s189_s10] sm:$0xff] %vm432_vm1, %v430_v39  ;;  %439 = vst.msk [vmem:[%s196_s9] sm:$0xff] %vm432_vm1, %v437_v5 }
 0x164   : > { %691 = shalt.err (!%p688_p5)
}
 0x165   : > { %s692_s8 = scalar_lea.hbm %s914_s26, 128  ;;  %s696_s11 = scalar_lea.hbm %s993_s2, 256 }
 0x166   : > { %p693_p6 = scmp.ne.s32.totalorder %s914_s26, %s692_s8  ;;  %p697_p10 = scmp.lt.u32.totalorder %s914_s26, %s993_s2 }
 0x167   : > { %p698_p11 = scmp.lt.u32.totalorder %s696_s11, %s692_s8  ;;  %p700_p13 = scmp.lt.u32.totalorder %s692_s8, %s914_s26 }
 0x168   : > { %p694_p7 = pnand %p693_p6, %p860_p4 }
 0x169   : > { %p699_p12 = por %p698_p11, %p697_p10 }
 0x16a   : > { %p695_p9 = pneg %p694_p7 }
 0x16b   : > { %p701_p0 = por %p700_p13, %p699_p12 }
 0x16d   : > { %p702_p1 = pnand %p701_p0, %p695_p9 }
 0x16f   : > { %705 = shalt.err (!%p702_p1)
}
 0x170   : > { %605 = dma.vmem_to_hbm [thread:$0]  (%p860_p4), %s916_s18, 128, %s914_s26, %s441_s15  }
 0x171   : > { %s446_s27 = scalar_lea.sflag [#allocation5], %s904_s6  ;;  %s706_s28 = scalar_lea.vmem %s923_s19, 128 }
 0x172   : > { %p707_p2 = scmp.ne.s32.totalorder %s923_s19, %s706_s28  ;;  %s799_s30 = smov [#allocation4]  }
 0x173   : > { %s710_s4 = sshll.u32 %s799_s30, 4  ;;  %s711_s4 = int_to_ptr.vmem [resolvable:$false] %s710_s4 }
 0x174   : > { %p708_p3 = pnand %p707_p2, %p860_p4  ;;  %s712_s5 = scalar_lea.vmem %s711_s4, 256 }
 0x175   : > { %p713_p6 = scmp.lt.s32.totalorder %s923_s19, %s711_s4  ;;  %p714_p7 = scmp.lt.s32.totalorder %s712_s5, %s706_s28 }
 0x176   : > { %p709_p5 = pneg %p708_p3 }
 0x177   : > { %p715_p9 = por %p714_p7, %p713_p6 }
 0x179   : > { %p716_p10 = pnand %p715_p9, %p709_p5 }
 0x17b   : > { %719 = shalt.err (!%p716_p10)
}
 0x17c   : > { %s720_s6 = scalar_lea.hbm %s921_s29, 128  ;;  %s724_s15 = scalar_lea.hbm %s994_s3, 256 }
 0x17d   : > { %p721_p11 = scmp.ne.s32.totalorder %s921_s29, %s720_s6  ;;  %p725_p0 = scmp.lt.u32.totalorder %s921_s29, %s994_s3 }
 0x17e   : > { %p726_p1 = scmp.lt.u32.totalorder %s724_s15, %s720_s6  ;;  %p728_p3 = scmp.lt.u32.totalorder %s720_s6, %s921_s29 }
 0x17f   : > { %p722_p12 = pnand %p721_p11, %p860_p4 }
 0x180   : > { %p727_p2 = por %p726_p1, %p725_p0 }
 0x181   : > { %p723_p13 = pneg %p722_p12 }
 0x182   : > { %p729_p5 = por %p728_p3, %p727_p2 }
 0x184   : > { %p730_p6 = pnand %p729_p5, %p723_p13 }
 0x186   : > { %733 = shalt.err (!%p730_p6)
}
 0x187   : > { %606 = dma.vmem_to_hbm [thread:$0]  (%p860_p4), %s923_s19, 128, %s921_s29, %s446_s27  }
 0x188 PF: > { %p616_p7 = scmp.ge.s32.totalorder %s788_s17, 2  ;;  %s486_s9 = sand.u32 1, %s768_s12  }
 0x189   : > { %s487_s10 = scalar_lea.sflag [#allocation3], %s486_s9 }
 0x18a   : > { %p610_p9 = pnand %p616_p7, %p867_p8 }
 0x18c   : > { %759 = dma.done.wait (!%p610_p9), %s487_s10, 128  }
 0x18d   : > { %761 = vsyncadd (!%p610_p9), %s487_s10, 4294967168  ;;  %s496_s11 = scalar_lea.sflag [#allocation5], %s486_s9 }
 0x18e   : > { %763 = dma.done.wait (!%p610_p9), %s496_s11, 128  }
 0x18f   : > { %765 = vsyncadd (!%p610_p9), %s496_s11, 4294967168  ;;  %s20_s17 = sadd.s32 1, %s788_s17   ;;  %s997_s12 = smov %s772_s13 }
 0x190   : > { %p17_p10 = scmp.ge.s32.totalorder %s20_s17, 4   ;;  %s998_s13 = smov %s776_s14 }
 0x191   : > { %s999_s14 = smov %s873_s25  ;;  %s1000_s15 = smov %s784_s16 }
 0x192   : > { %s1001_s16 = smov %s1003_s20  ;;  %19 = sbr.rel (!%p17_p10) target bundleno = 6 (0x6), region = 80 }
 0x199   :  { %501 = vsyncpa [#allocation3], 1 }
 0x19a   :  { %503 = vsyncpa [#allocation3 + $0x1], 1 }
 0x19b   :  { %504 = vsyncpa [#allocation5], 1 }
 0x19c   :  { %506 = vsyncpa [#allocation5 + $0x1], 1 }

</bundles_post_ra>
